<compile_context>
chip_gen: v6e
topology: v6e:2x2x1
jax: 0.10.0
libtpu: 0.0.40
codegen_flags: <defaults>
</compile_context>

<pallas_src>
import math

import jax
import jax.numpy as jnp
from jax.experimental import pallas as pl
from jax.experimental.pallas import tpu as pltpu


def _gfp_kernel(x_ref, p_ref, out_ref):
    # x_ref:   (tb, r)   f32  -- r consecutive time steps per folded row
    # p_ref:   (8k, L)   f32  -- rows [0:r]: block-diagonal W*2pi (row j is
    #                            nonzero only in lane group j), row [r]: phase
    #                            (0 for sin half, pi/2 for cos half), rest: pad
    # out_ref: (tb, L)        -- L = r * embed_dim, lane-dense single store
    r = x_ref.shape[1]
    x = x_ref[...]
    theta = x[:, 0:1] * p_ref[0:1, :]               # VPU lane-broadcast mul
    for j in range(1, r):                           # unrolled, r <= 4
        theta = theta + x[:, j:j + 1] * p_ref[j:j + 1, :]
    theta = theta + p_ref[r:r + 1, :]               # + phase (cos via sin(t+pi/2))
    out_ref[...] = jnp.sin(theta).astype(out_ref.dtype)   # one dense store


def gfp_init(W):
    """Precompute the packed kernel parameters from the frozen W (do once,
    alongside the parameter, not per forward call)."""
    W = jnp.asarray(W, jnp.float32)
    half = W.shape[0]
    embed_dim = 2 * half
    # Fold batch rows into lanes only when it yields an exactly 128-wide group.
    r = 128 // embed_dim if (embed_dim < 128 and 128 % embed_dim == 0) else 1
    lane_dim = r * embed_dim

    w2pi = jnp.tile(W, 2) * (2.0 * math.pi)                       # (D,)
    phase = jnp.concatenate([jnp.zeros((half,), jnp.float32),
                             jnp.full((half,), 0.5 * math.pi, jnp.float32)])
    # Block-diagonal expansion rows: wmat[j, k*D + d] = (j == k) * w2pi[d]
    wmat = (jnp.eye(r, dtype=jnp.float32)[:, :, None]
            * w2pi[None, None, :]).reshape(r, lane_dim)
    phase_row = jnp.tile(phase, r).reshape(1, lane_dim)
    pad_rows = (-(r + 1)) % 8                                     # sublane pad
    params = jnp.concatenate(
        [wmat, phase_row, jnp.zeros((pad_rows, lane_dim), jnp.float32)], axis=0)
    return params, r, embed_dim


def _pick_block_rows(b_fold, lane_dim, out_elem_bytes):
    """Batch-fold tile: ~4 MiB output block (double-buffered ~8 MiB, under all
    scoped-VMEM defaults), capped so there are >= ~4 grid blocks when possible
    (pipeline overlap + v7x megacore). Multiple of 8 sublanes."""
    if b_fold <= 8:
        return b_fold
    target_bytes = 4 * 1024 * 1024
    tb = max(8, (target_bytes // (lane_dim * out_elem_bytes)) // 8 * 8)
    quarter = (b_fold + 3) // 4
    cap = max(8, ((quarter + 7) // 8) * 8)
    return min(tb, cap)


def gfp_apply(x, gfp_params, *, block_rows=None, out_dtype=jnp.float32):
    """x: (B,) time steps. Returns (B, embed_dim) = [sin(xW2pi), cos(xW2pi)]."""
    params, r, embed_dim = gfp_params
    lane_dim = r * embed_dim
    B = x.shape[0]

    x32 = x.astype(jnp.float32)
    b_pad = pl.cdiv(B, r) * r
    if b_pad != B:
        x32 = jnp.concatenate([x32, jnp.zeros((b_pad - B,), jnp.float32)])
    b_fold = b_pad // r
    x2d = x32.reshape(b_fold, r)

    out_bytes = jnp.dtype(out_dtype).itemsize
    tb = block_rows if block_rows is not None else _pick_block_rows(
        b_fold, lane_dim, out_bytes)
    grid = (pl.cdiv(b_fold, tb),)
    p_rows = params.shape[0]

    out2d = pl.pallas_call(
        _gfp_kernel,
        out_shape=jax.ShapeDtypeStruct((b_fold, lane_dim), out_dtype),
        grid=grid,
        in_specs=[
            pl.BlockSpec((tb, r), lambda i: (i, 0)),           # folded x tile
            pl.BlockSpec((p_rows, lane_dim), lambda i: (0, 0)),  # packed params
        ],
        out_specs=pl.BlockSpec((tb, lane_dim), lambda i: (i, 0)),
        compiler_params=pltpu.CompilerParams(
            dimension_semantics=("parallel",)),
        cost_estimate=pl.CostEstimate(
            flops=2 * b_pad * embed_dim * (r + 1) // max(r, 1),
            transcendentals=b_pad * embed_dim,
            bytes_accessed=(b_pad * embed_dim * out_bytes
                            + b_pad * 4 + params.size * 4)),
    )(x2d, params)

    out = out2d.reshape(b_pad, embed_dim)
    if b_pad != B:
        out = out[:B]
    return out


def gaussian_fourier_projection(x, W, *, block_rows=None, out_dtype=jnp.float32):
    """Convenience wrapper matching GaussianFourierProjection.forward."""
    return gfp_apply(x, gfp_init(W), block_rows=block_rows, out_dtype=out_dtype)


if __name__ == "__main__":
    key = jax.random.PRNGKey(0)
    k_w, k_x = jax.random.split(key)

    scale = 30.0

    def reference(x, W):
        xp = x[:, None] * W[None, :] * 2.0 * math.pi
        return jnp.concatenate([jnp.sin(xp), jnp.cos(xp)], axis=-1)

    # --- Test 1: embed_dim=32 (r=4 lane fold), batch=8 ---
    embed_dim, batch = 32, 8
    W = jax.random.normal(k_w, (embed_dim // 2,), dtype=jnp.float32) * scale
    x = jax.random.uniform(k_x, (batch,), dtype=jnp.float32)
    out = jax.block_until_ready(gaussian_fourier_projection(x, W))
    assert out.shape == (batch, embed_dim)
    assert jnp.allclose(out, reference(x, W), atol=2e-4, rtol=1e-5)

    # --- Test 2: embed_dim=64 (r=2), batch=50 -> 4 grid blocks + partial last ---
    k_w2, k_x2 = jax.random.split(k_x)
    embed2, batch2 = 64, 50
    W2 = jax.random.normal(k_w2, (embed2 // 2,), dtype=jnp.float32) * scale
    x2 = jax.random.uniform(k_x2, (batch2,), dtype=jnp.float32)
    out2 = jax.block_until_ready(gaussian_fourier_projection(x2, W2))
    assert out2.shape == (batch2, embed2)
    assert jnp.allclose(out2, reference(x2, W2), atol=2e-4, rtol=1e-5)

    # --- Test 3: batch not a multiple of the fold factor (pad + slice path) ---
    k_w3, k_x3 = jax.random.split(k_x2)
    embed3, batch3 = 32, 7
    W3 = jax.random.normal(k_w3, (embed3 // 2,), dtype=jnp.float32) * scale
    x3 = jax.random.uniform(k_x3, (batch3,), dtype=jnp.float32)
    out3 = jax.block_until_ready(gaussian_fourier_projection(x3, W3))
    assert out3.shape == (batch3, embed3)
    assert jnp.allclose(out3, reference(x3, W3), atol=2e-4, rtol=1e-5)

    print("KERNEL_OK")
</pallas_src>

<mosaic_0001>
module attributes {stable_mosaic.version = 11 : i64} {
  func.func @_gfp_kernel(%arg0: i32, %arg1: memref<2x4xf32, #tpu.memory_space<vmem>>, %arg2: memref<8x128xf32, #tpu.memory_space<vmem>>, %arg3: memref<2x128xf32, #tpu.memory_space<vmem>>) attributes {dimension_semantics = [#tpu.dimension_semantics<parallel>], iteration_bounds = array<i64: 1>, scalar_prefetch = 0 : i64, scratch_operands = 0 : i64, tpu.core_type = #tpu.core_type<tc>, window_params = [{transform_indices = @transform_0, window_bounds = array<i64: 2, 4>}, {pipeline_mode = #tpu.pipeline_mode<synchronous>, transform_indices = @transform_1, window_bounds = array<i64: 8, 128>}, {transform_indices = @transform_2, window_bounds = array<i64: 2, 128>}]} {
    %c0 = arith.constant 0 : index
    %c0_0 = arith.constant 0 : index
    %0 = vector.load %arg1[%c0, %c0_0] : memref<2x4xf32, #tpu.memory_space<vmem>>, vector<2x4xf32>
    %1 = vector.extract_strided_slice %0 {offsets = [0, 0], sizes = [2, 1], strides = [1, 1]} : vector<2x4xf32> to vector<2x1xf32>
    %c0_1 = arith.constant 0 : index
    %c0_2 = arith.constant 0 : index
    %2 = vector.load %arg2[%c0_1, %c0_2] : memref<8x128xf32, #tpu.memory_space<vmem>>, vector<1x128xf32>
    %3 = vector.broadcast %1 : vector<2x1xf32> to vector<2x128xf32>
    %4 = vector.broadcast %2 : vector<1x128xf32> to vector<2x128xf32>
    %5 = arith.mulf %3, %4 : vector<2x128xf32>
    %6 = vector.extract_strided_slice %0 {offsets = [0, 1], sizes = [2, 1], strides = [1, 1]} : vector<2x4xf32> to vector<2x1xf32>
    %c1 = arith.constant 1 : index
    %c0_3 = arith.constant 0 : index
    %7 = vector.load %arg2[%c1, %c0_3] : memref<8x128xf32, #tpu.memory_space<vmem>>, vector<1x128xf32>
    %8 = vector.broadcast %6 : vector<2x1xf32> to vector<2x128xf32>
    %9 = vector.broadcast %7 : vector<1x128xf32> to vector<2x128xf32>
    %10 = arith.mulf %8, %9 : vector<2x128xf32>
    %11 = arith.addf %5, %10 : vector<2x128xf32>
    %12 = vector.extract_strided_slice %0 {offsets = [0, 2], sizes = [2, 1], strides = [1, 1]} : vector<2x4xf32> to vector<2x1xf32>
    %c2 = arith.constant 2 : index
    %c0_4 = arith.constant 0 : index
    %13 = vector.load %arg2[%c2, %c0_4] : memref<8x128xf32, #tpu.memory_space<vmem>>, vector<1x128xf32>
    %14 = vector.broadcast %12 : vector<2x1xf32> to vector<2x128xf32>
    %15 = vector.broadcast %13 : vector<1x128xf32> to vector<2x128xf32>
    %16 = arith.mulf %14, %15 : vector<2x128xf32>
    %17 = arith.addf %11, %16 : vector<2x128xf32>
    %18 = vector.extract_strided_slice %0 {offsets = [0, 3], sizes = [2, 1], strides = [1, 1]} : vector<2x4xf32> to vector<2x1xf32>
    %c3 = arith.constant 3 : index
    %c0_5 = arith.constant 0 : index
    %19 = vector.load %arg2[%c3, %c0_5] : memref<8x128xf32, #tpu.memory_space<vmem>>, vector<1x128xf32>
    %20 = vector.broadcast %18 : vector<2x1xf32> to vector<2x128xf32>
    %21 = vector.broadcast %19 : vector<1x128xf32> to vector<2x128xf32>
    %22 = arith.mulf %20, %21 : vector<2x128xf32>
    %23 = arith.addf %17, %22 : vector<2x128xf32>
    %c4 = arith.constant 4 : index
    %c0_6 = arith.constant 0 : index
    %24 = vector.load %arg2[%c4, %c0_6] : memref<8x128xf32, #tpu.memory_space<vmem>>, vector<1x128xf32>
    %25 = vector.broadcast %24 : vector<1x128xf32> to vector<2x128xf32>
    %26 = arith.addf %23, %25 : vector<2x128xf32>
    %27 = math.sin %26 : vector<2x128xf32>
    %c0_7 = arith.constant 0 : index
    %c0_8 = arith.constant 0 : index
    %28 = vector.load %arg3[%c0_7, %c0_8] : memref<2x128xf32, #tpu.memory_space<vmem>>, vector<2x128xf32>
    tpu.vector_store %arg3[%c0_7, %c0_8], %27 {strides = array<i32>} : memref<2x128xf32, #tpu.memory_space<vmem>>, vector<2x128xf32>,
    return
  }
  func.func @transform_0(%arg0: i32) -> (i32, i32) {
    %c0_i32 = arith.constant 0 : i32
    %c0_i32_0 = arith.constant 0 : i32
    return %arg0, %c0_i32 : i32, i32
  }
  func.func @transform_1(%arg0: i32) -> (i32, i32) {
    %c0_i32 = arith.constant 0 : i32
    %c0_i32_0 = arith.constant 0 : i32
    %c0_i32_1 = arith.constant 0 : i32
    return %c0_i32, %c0_i32_0 : i32, i32
  }
  func.func @transform_2(%arg0: i32) -> (i32, i32) {
    %c0_i32 = arith.constant 0 : i32
    %c0_i32_0 = arith.constant 0 : i32
    return %arg0, %c0_i32 : i32, i32
  }
}

</mosaic_0001>

<bundles_post_ra>
// kernel: tpu_custom_call.1
= control target key start
LH: loop header
LB: loop body
LE: loop exit
PB: predicated region body
PF: predicated region fallthrough
CT: control target
= control target key end

     0   :  { %7 = vsyncpa [#allocation3], 0  ;;  %s367_s0 = inlined_call_operand.hbm [shape: f32[2,4], index: 0, kind: input, shape index: {}]   ;;  %s368_s1 = inlined_call_operand.hbm [shape: f32[8,128], index: 1, kind: input, shape index: {}]   ;;  %s369_s2 = inlined_call_operand.hbm [shape: f32[2,128], index: 2, kind: output, shape index: {}]  }
   0x1   :  { %8 = vsyncpa [#allocation6], 0 }
   0x2   :  { %9 = vsyncpa [#allocation4], 0  ;;  %s309_s9 = smov [#allocation2]   ;;  %s310_s11 = smov [#allocation5]  }
   0x3   :  { %s16_s10 = sshll.u32 %s309_s9, 4  ;;  %s26_s12 = sshll.u32 %s310_s11, 4  ;;  %s17_s10 = int_to_ptr.vmem [resolvable:$true] %s16_s10  ;;  %s27_s12 = int_to_ptr.vmem [resolvable:$true] %s26_s12 }
   0x4   :  { %s251_s13 = scalar_lea.vmem %s17_s10, 32  ;;  %p256_p1 = scmp.lt.s32.totalorder %s17_s10, %s17_s10 }
   0x5   :  { %p252_p0 = scmp.ne.s32.totalorder %s17_s10, %s251_s13  ;;  %p257_p2 = scmp.lt.s32.totalorder %s251_s13, %s251_s13 }
   0x7   :  { %p258_p3 = por %p257_p2, %p256_p1 }
   0x9   :  { %p259_p4 = pnand %p258_p3, %p252_p0 }
   0xb   :  { %262 = shalt.err (!%p259_p4)
}
   0xc   :  { %19 = dma.hbm_to_vmem [thread:$0]  %s367_s0, 32, %s17_s10, [#allocation3]  }
   0xd   :  { %s271_s16 = scalar_lea.vmem %s27_s12, 128  ;;  %p276_p6 = scmp.lt.s32.totalorder %s27_s12, %s27_s12 }
   0xe   :  { %p272_p5 = scmp.ne.s32.totalorder %s27_s12, %s271_s16  ;;  %p277_p7 = scmp.lt.s32.totalorder %s271_s16, %s271_s16 }
  0x10   :  { %p278_p8 = por %p277_p7, %p276_p6 }
  0x12   :  { %p279_p9 = pnand %p278_p8, %p272_p5 }
  0x14   :  { %282 = shalt.err (!%p279_p9)
}
  0x15   :  { %29 = dma.hbm_to_vmem [thread:$0]  %s368_s1, 128, %s27_s12, [#allocation6]  }
  0x16   :  { %303 = dma.done.wait [#allocation3], 32  }
  0x17   :  { %304 = vsyncadd [#allocation3], 4294967264 }
  0x18   :  { %305 = dma.done.wait [#allocation6], 128  }
  0x19   :  { %306 = vsyncadd [#allocation6], 4294967168  ;;  %v311_v0 = vmov 0   ;;  %v312_v1 = vmov 2   ;;  %v36_v2 = vld [vmem:[#allocation2] sm:$0x3] }
  0x1a   :  { %234 = vset.pattern.permute.xlu0 %v311_v0  ;;  %236 = vset.pattern.permute.xlu1 %v312_v1  ;;  %v313_v3 = vmov 1   ;;  %v314_v4 = vmov 3   ;;  %v208_v7 = vld [vmem:[#allocation5] ss:$0 sm:$0xff]  ;;  %v209_v8 = vld [vmem:[#allocation5 + $0x1] ss:$0 sm:$0xff] }
  0x1b   :  { %40 = vperm.xlu0 %234, %v36_v2   ;;  %61 = vperm.xlu1 %236, %v36_v2   ;;  %v210_v9 = vld [vmem:[#allocation5 + $0x2] ss:$0 sm:$0xff]  ;;  %v211_v11 = vld [vmem:[#allocation5 + $0x3] ss:$0 sm:$0xff]  ;;  %v212_v19 = vld [vmem:[#allocation5 + $0x4] ss:$0 sm:$0xff] }
  0x1c   :  { %v315_v32 = vmov 683565275   ;;  %v316_v34 = vmov 2475754826   ;;  %v317_v37 = vmov 2131351028  }
  0x1d   :  { %v318_v40 = vmov 2102212464   ;;  %v319_v43 = vmov 920167782   ;;  %v320_v46 = vmov 1326507024  }
  0x1e   :  { %s321_s0 = smov [#allocation7]  }
  0x1f   :  { %235 = vset.pattern.permute.xlu0 %v313_v3  ;;  %237 = vset.pattern.permute.xlu1 %v314_v4  ;;  %s198_s1 = sshll.u32 %s321_s0, 4  ;;  %s199_s1 = int_to_ptr.vmem [resolvable:$true] %s198_s1 }
  0x20   :  { %50 = vperm.xlu0 %235, %v36_v2   ;;  %72 = vperm.xlu1 %237, %v36_v2   ;;  %s283_s19 = scalar_lea.vmem %s199_s1, 32  ;;  %p288_p11 = scmp.lt.s32.totalorder %s199_s1, %s199_s1 }
  0x21   :  { %p284_p10 = scmp.ne.s32.totalorder %s199_s1, %s283_s19  ;;  %p289_p12 = scmp.lt.s32.totalorder %s283_s19, %s283_s19 }
  0x23   :  { %p290_p13 = por %p289_p12, %p288_p11 }
  0x24   :  { %238 = vset.pattern.permute.xlu0 %v314_v4 }
  0x25   :  { %p291_p0 = pnand %p290_p13, %p284_p10 }
  0x96   :  { %v41_v5 = vpop.permute.xlu0 %40  ;;  %v62_v6 = vpop.permute.xlu1 %61 }
  0x97   :  { %v47_v13 = vmul.f32 %v208_v7, %v41_v5  ;;  %v68_v15 = vmul.f32 %v210_v9, %v62_v6 }
  0x9b   :  { %v51_v10 = vpop.permute.xlu0 %50  ;;  %v73_v12 = vpop.permute.xlu1 %72 }
  0x9c   :  { %v57_v14 = vmul.f32 %v209_v8, %v51_v10  ;;  %v79_v17 = vmul.f32 %v211_v11, %v73_v12 }
  0x9e   :  { %v58_v16 = vadd.f32 %v57_v14, %v47_v13 }
  0xa0   :  { %v69_v18 = vadd.f32 %v68_v15, %v58_v16 }
  0xa2   :  { %v80_v20 = vadd.f32 %v79_v17, %v69_v18 }
  0xa4   :  { %v343_v21 = vadd.f32 %v212_v19, %v80_v20 }
  0xa6   :  { %v90_v22 = vand.u32 2139095040, %v343_v21  ;;  %v87_v26 = vand.u32 2147483647, %v343_v21  ;;  %vm89_vm7 = vcmp.lt.s32.totalorder %v343_v21, 0  ;;  %vm179_vm12 = vweird.f32 %v343_v21 }
  0xa8   :  { %v91_v23 = vshrl.u32 %v90_v22, 23  ;;  %v94_v30 = vand.u32 8388607, %v87_v26  ;;  %vm88_vm8 = vcmp.le.f32.partialorder %v87_v26, 0.7853982 }
  0xaa   :  { %v213_v24 = vadd.s32 4294967169, %v91_v23  ;;  %v95_v48 = vor.u32 8388608, %v94_v30 }
  0xac   :  { %v97_v25 = vadd.s32 1, %v213_v24  ;;  %v135_v62 = vshll.u32 %v95_v48, 8 }
  0xae   :  { %vm98_vm0 = vcmp.gt.s32.totalorder %v97_v25, 0 }
  0xaf   :  { %v99_v27 = vsel %vm98_vm0, %v97_v25, 0 }
  0xb0   :  { %v101_v28 = vand.u32 31, %v99_v27  ;;  %v100_v31 = vshrl.u32 %v99_v27, 5 }
  0xb2   :  { %v102_v29 = vsub.s32 32, %v101_v28  ;;  %v104_v33 = vshll.u32 %v315_v32, %v101_v28  ;;  %v107_v35 = vshll.u32 %v316_v34, %v101_v28  ;;  %v110_v39 = vshll.u32 %v317_v37, %v101_v28 }
  0xb3   :  { %v113_v42 = vshll.u32 %v318_v40, %v101_v28  ;;  %v116_v45 = vshll.u32 %v319_v43, %v101_v28  ;;  %vm119_vm1 = vcmp.lt.s32.totalorder %v100_v31, 1  ;;  %vm122_vm2 = vcmp.lt.s32.totalorder %v100_v31, 4 }
  0xb4   :  { %v105_v36 = vshrl.u32 %v316_v34, %v102_v29  ;;  %v108_v38 = vshrl.u32 %v317_v37, %v102_v29  ;;  %v111_v41 = vshrl.u32 %v318_v40, %v102_v29  ;;  %v114_v44 = vshrl.u32 %v319_v43, %v102_v29 }
  0xb5   :  { %v117_v47 = vshrl.u32 %v320_v46, %v102_v29  ;;  %v103_v57 = vshrl.u32 %v315_v32, %v102_v29  ;;  %vm121_vm3 = vcmp.lt.s32.totalorder %v100_v31, 3  ;;  %vm120_vm4 = vcmp.lt.s32.totalorder %v100_v31, 2 }
  0xb6   :  { %v106_v49 = vor.u32 %v105_v36, %v104_v33  ;;  %v109_v50 = vor.u32 %v108_v38, %v107_v35  ;;  %v112_v51 = vor.u32 %v111_v41, %v110_v39  ;;  %v115_v52 = vor.u32 %v114_v44, %v113_v42 }
  0xb7   :  { %v118_v53 = vor.u32 %v117_v47, %v116_v45 }
  0xb8   :  { %v124_v54 = vsel %vm122_vm2, %v112_v51, 2102212464  ;;  %v127_v55 = vsel %vm119_vm1, %v106_v49, %v109_v50  ;;  %v131_v56 = vsel %vm119_vm1, %v109_v50, %v112_v51  ;;  %v128_v58 = vsel %vm122_vm2, %v115_v52, 920167782 }
  0xb9   :  { %v132_v59 = vsel %vm122_vm2, %v118_v53, 1326507024  ;;  %v129_v60 = vsel %vm121_vm3, %v112_v51, %v128_v58  ;;  %v123_v63 = vsel %vm119_vm1, %v103_v57, %v106_v49  ;;  %v125_v0 = vsel %vm121_vm3, %v109_v50, %v124_v54 }
  0xba   :  { %v133_v61 = vsel %vm121_vm3, %v115_v52, %v132_v59  ;;  %v130_v1 = vsel %vm120_vm4, %v127_v55, %v129_v60  ;;  %v126_v7 = vsel %vm120_vm4, %v123_v63, %v125_v0 }
  0xbb   :  { %v134_v2 = vsel %vm120_vm4, %v131_v56, %v133_v61  ;;  %v352_v5 = vmul.u32.u64.low %v135_v62, %v130_v1  ;;  %v353_v6 = vmul.u32.u64.high %v135_v62, %v130_v1, %v352_v5  ;;  %v142_v9 = vmul.u32 %v135_v62, %v126_v7 }
  0xbc   :  { %v349_v3 = vmul.u32.u64.low %v135_v62, %v134_v2  ;;  %v350_v4 = vmul.u32.u64.high %v135_v62, %v134_v2, %v349_v3 }
  0xbd   :  { %v145_v8 = vadd.s32 1, %v353_v6 }
  0xbe   :  { %vm144_vm5 = vc.u32 %v350_v4, %v352_v5  ;;  %v143_v22 = vadd.s32 %v352_v5, %v350_v4 }
  0xbf   :  { %v146_v10 = vsel %vm144_vm5, %v145_v8, %v353_v6 }
  0xc0   :  { %v147_v11 = vadd.s32 %v146_v10, %v142_v9 }
  0xc2   :  { %v148_v12 = vadd.s32 536870912, %v147_v11 }
  0xc4   :  { %v149_v13 = vshrl.u32 %v148_v12, 30 }
  0xc6   :  { %v150_v14 = vshll.u32 %v149_v13, 30  ;;  %v173_v36 = vsub.s32 4, %v149_v13 }
  0xc8   :  { %v151_v15 = vsub.s32 %v147_v11, %v150_v14  ;;  %v174_v39 = vsel %vm89_vm7, %v173_v36, %v149_v13 }
  0xc9   :  { %v176_v40 = vsel %vm88_vm8, 0, %v174_v39 }
  0xca   :  { %v153_v16 = vsub.s32 0, %v151_v15  ;;  %v180_v41 = vadd.s32 3, %v176_v40 }
  0xcc   :  { %v214_v17 = vmin.u32 %v153_v16, %v151_v15  ;;  %v181_v42 = vand.u32 3, %v180_v41 }
  0xce   :  { %v155_v18 = vclz %v214_v17  ;;  %vm186_vm9 = vcmp.eq.s32.totalorder %v181_v42, 2  ;;  %vm183_vm10 = vcmp.eq.s32.totalorder %v181_v42, 0  ;;  %vm182_vm11 = vcmp.lt.s32.totalorder %v181_v42, 2 }
  0xd0   :  { %v215_v19 = vadd.s32 4294967294, %v155_v18 }
  0xd2   :  { %vm216_vm6 = vcmp.lt.s32.totalorder %v215_v19, 0 }
  0xd3   :  { %v158_v20 = vsel %vm216_vm6, 0, %v215_v19 }
  0xd4   :  { %v159_v23 = vsub.s32 32, %v158_v20  ;;  %v163_v24 = vsub.s32 4294967266, %v158_v20  ;;  %v160_v25 = vshll.u32 %v151_v15, %v158_v20 }
  0xd6   :  { %v161_v27 = vshrl.u32 %v143_v22, %v159_v23  ;;  %v164_v28 = vadd.s32 127, %v163_v24 }
  0xd8   :  { %v162_v29 = vor.u32 %v161_v27, %v160_v25  ;;  %v165_v30 = vshll.u32 %v164_v28, 23 }
  0xda   :  { %v166_v31 = vor.u32 4788187, %v165_v30  ;;  %v169_v33 = vcvt.s32.f32 %v162_v29 }
  0xdc   :  { %v167_v32 = vand.u32 2147483647, %v166_v31 }
  0xde   :  { %v170_v34 = vmul.f32 %v169_v33, %v167_v32 }
  0xe0   :  { %v171_v35 = vxor.u32 2147483648, %v170_v34 }
  0xe2   :  { %v172_v37 = vsel %vm89_vm7, %v171_v35, %v170_v34 }
  0xe3   :  { %v175_v38 = vsel %vm88_vm8, %v343_v21, %v172_v37 }
  0xe4   :  { %239 = vcosq.f32 %v175_v38 }
  0xe5   :  { %241 = vsinq.f32 %v175_v38 }
  0xf1   :  { %v240_v43 = vpop.eup %239 }
  0xf2   :  { %v242_v44 = vpop.eup %241  ;;  %v187_v45 = vxor.u32 2147483648, %v240_v43 }
  0xf3   :  { %v184_v46 = vxor.u32 2147483648, %v242_v44 }
  0xf4   :  { %v188_v47 = vsel %vm186_vm9, %v187_v45, %v242_v44 }
  0xf5   :  { %v185_v26 = vsel %vm183_vm10, %v240_v43, %v184_v46 }
  0xf6   :  { %v189_v48 = vsel %vm182_vm11, %v185_v26, %v188_v47 }
  0xf7   :  { %v190_v49 = vsel %vm179_vm12, nan, %v189_v48 }
  0xf8   :  { %191 = vst [vmem:[#allocation7] sm:$0x3] %v190_v49 }
  0xf9   :  { %294 = shalt.err (!%p291_p0)
}
  0xfa   :  { %201 = dma.vmem_to_hbm [thread:$0]  %s199_s1, 32, %s369_s2, [#allocation4]  }
  0xfb   :  { %307 = dma.done.wait [#allocation4], 32  }
  0xfc   :  { %308 = vsyncadd [#allocation4], 4294967264 }
  0xfd   :  { %205 = vsyncpa [#allocation3], 1 }
  0xfe   :  { %206 = vsyncpa [#allocation6], 1 }
  0xff   :  { %207 = vsyncpa [#allocation4], 1 }

</bundles_post_ra>
